<compile_context>
chip_gen: v5e
topology: v5e:2x2
jax: 0.10.0
libtpu: 0.0.40
codegen_flags: <defaults>
</compile_context>

<pallas_src>
import functools

import numpy as np

import jax
import jax.numpy as jnp
from jax import lax
from jax.experimental import pallas as pl
from jax.experimental.pallas import tpu as pltpu

KH = KW = 5        # conv kernel size (both conv layers)
K1_PAD = 128       # conv1 contraction dim (C*KH*KW = 100) zero-padded to 128


# ----------------------------------------------------------------------------
# Fused Pallas kernel
# ----------------------------------------------------------------------------
def _convnet_kernel(cols1_ref, w1_ref, b1_ref, w2_ref, b2_ref,
                    wf1_ref, bf1_ref, wf2_ref, bf2_ref, wf3_ref, bf3_ref,
                    out_ref, *, n, ph, pw, kh, kw):
    oh2, ow2 = ph - kh + 1, pw - kw + 1                 # conv2 out spatial (2, 2)
    win = ((oh2 - 1) * pw + ow2) * n                    # rows per conv2 tap window (16)
    blk = ph * pw * n                                   # rows per pooling-phase block (72)

    # ---- conv1 + bias + ReLU: im2col matmul (bf16 MXU, f32 accumulate) -------
    # cols1 rows ordered (sy, sx, py, px, n); lanes = padded (c, ky, kx) features.
    y1 = jnp.dot(cols1_ref[...], w1_ref[...], preferred_element_type=jnp.float32)
    y1 = jnp.maximum(y1 + b1_ref[...], 0.0)             # (4*blk, 32) f32

    # ---- maxpool1 (2x2): elementwise max of 4 contiguous (sy, sx) blocks -----
    p1 = jnp.maximum(jnp.maximum(y1[0 * blk:1 * blk], y1[1 * blk:2 * blk]),
                     jnp.maximum(y1[2 * blk:3 * blk], y1[3 * blk:4 * blk]))
    p1 = p1.astype(jnp.bfloat16)                        # single bf16 cast, rows (py,px,n)

    # ---- conv2 + bias + ReLU: ONE consolidated matmul ------------------------
    # For tap (ky, kx) the 16-row window starting at (ky*pw+kx)*n holds, at
    # window row (oy*pw+ox)*n + b, the pooled pixel needed for output (oy,ox,b);
    # the 25 windows are concatenated along lanes -> LHS (16, 800), and w2 is
    # the matching (25*32, 64) stack, so one dot yields all conv2 outputs.
    windows = [p1[(ky * pw + kx) * n:(ky * pw + kx) * n + win, :]
               for ky in range(kh) for kx in range(kw)]
    lhs2 = jnp.concatenate(windows, axis=1)             # (16, 800) bf16
    y2 = jnp.dot(lhs2, w2_ref[...], preferred_element_type=jnp.float32)
    y2 = jnp.maximum(y2 + b2_ref[...], 0.0)             # (16, 64) f32

    # ---- maxpool2 (2x2 over the 2x2 map) + NCHW flatten -----------------------
    groups = [y2[(oy * pw + ox) * n:(oy * pw + ox) * n + n, :]
              for oy in range(oh2) for ox in range(ow2)]
    feat = functools.reduce(jnp.maximum, groups).astype(jnp.bfloat16)   # (n, 64)

    # ---- fc1 + ReLU, fc2 + ReLU, fc3 (dependent chain; latency-bound at n=2) --
    h = jnp.maximum(jnp.dot(feat, wf1_ref[...],
                            preferred_element_type=jnp.float32) + bf1_ref[...], 0.0)
    h = jnp.maximum(jnp.dot(h.astype(jnp.bfloat16), wf2_ref[...],
                            preferred_element_type=jnp.float32) + bf2_ref[...], 0.0)
    out = jnp.dot(h.astype(jnp.bfloat16), wf3_ref[...],
                  preferred_element_type=jnp.float32) + bf3_ref[...]
    out_ref[...] = out.astype(out_ref.dtype)


# ----------------------------------------------------------------------------
# Wrapper-side glue: ONE constant-index gather builds the pool-friendly im2col
# ----------------------------------------------------------------------------
def _build_gather_indices(n, c_in, h, w, kh, kw, k_pad):
    """int32 (4*PH*PW*N, k_pad) indices into x.reshape(-1).

    Row order (sy, sx, py, px, n); column order (c, ky, kx), zero-index padded
    to k_pad (the matching w1 rows are zero, so padded columns contribute 0).
    """
    oh, ow = h - kh + 1, w - kw + 1
    ph, pw = oh // 2, ow // 2
    idx = np.zeros((4 * ph * pw * n, k_pad), dtype=np.int32)
    for sy in range(2):
        for sx in range(2):
            for py in range(ph):
                for px in range(pw):
                    for nn in range(n):
                        r = ((((sy * 2 + sx) * ph + py) * pw + px) * n + nn)
                        oy, ox = 2 * py + sy, 2 * px + sx
                        for c in range(c_in):
                            for ky in range(kh):
                                for kx in range(kw):
                                    col = (c * kh + ky) * kw + kx
                                    idx[r, col] = (((nn * c_in + c) * h
                                                    + oy + ky) * w + ox + kx)
    return idx


# ----------------------------------------------------------------------------
# Forward pass (single fused pallas_call)
# ----------------------------------------------------------------------------
@jax.jit
def convnet_forward(kp, x):
    n, c, h, w = x.shape
    kh, kw = KH, KW
    oh1, ow1 = h - kh + 1, w - kw + 1
    ph, pw = oh1 // 2, ow1 // 2
    oh2, ow2 = ph - kh + 1, pw - kw + 1
    assert oh2 == 2 and ow2 == 2, "kernel specialised to the 16x16 ConvNet geometry"

    # Single fused gather + bf16 cast (constant index table built at trace time).
    idx = _build_gather_indices(n, c, h, w, kh, kw, K1_PAD)
    cols1 = x.reshape(-1)[idx].astype(jnp.bfloat16)          # (288, 128)

    oc1 = kp["w1"].shape[1]
    k2, oc2 = kp["w2"].shape
    n_out = kp["bf3"].shape[1]
    win = ((oh2 - 1) * pw + ow2) * n

    flops = 2 * (cols1.shape[0] * K1_PAD * oc1
                 + win * k2 * oc2
                 + n * (kp["wf1"].shape[0] * kp["wf1"].shape[1]
                        + kp["wf2"].shape[0] * kp["wf2"].shape[1]
                        + kp["wf3"].shape[0] * kp["wf3"].shape[1]))
    bytes_accessed = (sum(int(v.size) * v.dtype.itemsize for v in kp.values())
                      + int(cols1.size) * 2 + n * n_out * 4)

    kernel = functools.partial(_convnet_kernel, n=n, ph=ph, pw=pw, kh=kh, kw=kw)
    return pl.pallas_call(
        kernel,
        out_shape=jax.ShapeDtypeStruct((n, n_out), jnp.float32),
        in_specs=[pl.BlockSpec(memory_space=pltpu.MemorySpace.VMEM)] * 11,
        out_specs=pl.BlockSpec(memory_space=pltpu.MemorySpace.VMEM),
        cost_estimate=pl.CostEstimate(flops=flops, transcendentals=0,
                                      bytes_accessed=bytes_accessed),
    )(cols1, kp["w1"], kp["b1"], kp["w2"], kp["b2"],
      kp["wf1"], kp["bf1"], kp["wf2"], kp["bf2"], kp["wf3"], kp["bf3"])


# ----------------------------------------------------------------------------
# Parameters (deterministic, PyTorch-style uniform(+-1/sqrt(fan_in)) init)
# ----------------------------------------------------------------------------
def _uniform(key, shape, fan_in):
    bound = 1.0 / jnp.sqrt(jnp.float32(fan_in))
    return jax.random.uniform(key, shape, jnp.float32, -bound, bound)


def init_params(key, num_channels, flat_features):
    ks = jax.random.split(key, 10)
    p = {}
    p["conv1_w"] = _uniform(ks[0], (32, num_channels, KH, KW), num_channels * KH * KW)
    p["conv1_b"] = _uniform(ks[1], (32,), num_channels * KH * KW)
    p["conv2_w"] = _uniform(ks[2], (64, 32, KH, KW), 32 * KH * KW)
    p["conv2_b"] = _uniform(ks[3], (64,), 32 * KH * KW)
    p["fc1_w"] = _uniform(ks[4], (128, flat_features), flat_features)
    p["fc1_b"] = _uniform(ks[5], (128,), flat_features)
    p["fc2_w"] = _uniform(ks[6], (64, 128), 128)
    p["fc2_b"] = _uniform(ks[7], (64,), 128)
    p["fc3_w"] = _uniform(ks[8], (10, 64), 64)
    p["fc3_b"] = _uniform(ks[9], (10,), 64)
    return p


def prepare_params(p):
    """One-time re-layout: flatten/transpose/pad weights, bf16 for MXU, f32 biases."""
    oc1 = p["conv1_w"].shape[0]
    oc2, c2 = p["conv2_w"].shape[0], p["conv2_w"].shape[1]
    w1 = p["conv1_w"].reshape(oc1, -1).T                       # (100, 32), rows (c,ky,kx)
    w1 = jnp.pad(w1, ((0, K1_PAD - w1.shape[0]), (0, 0)))      # zero-pad K to 128
    # conv2 weight: per-tap (C2, OC2) matrices stacked along K, tap order (ky, kx)
    w2 = p["conv2_w"].transpose(2, 3, 1, 0).reshape(KH * KW * c2, oc2)   # (800, 64)
    return {
        "w1": w1.astype(jnp.bfloat16),
        "b1": p["conv1_b"].reshape(1, -1).astype(jnp.float32),
        "w2": w2.astype(jnp.bfloat16),
        "b2": p["conv2_b"].reshape(1, -1).astype(jnp.float32),
        "wf1": p["fc1_w"].T.astype(jnp.bfloat16),
        "bf1": p["fc1_b"].reshape(1, -1).astype(jnp.float32),
        "wf2": p["fc2_w"].T.astype(jnp.bfloat16),
        "bf2": p["fc2_b"].reshape(1, -1).astype(jnp.float32),
        "wf3": p["fc3_w"].T.astype(jnp.bfloat16),
        "bf3": p["fc3_b"].reshape(1, -1).astype(jnp.float32),
    }


# ----------------------------------------------------------------------------
# Pure-XLA reference (independent path) for a sanity check
# ----------------------------------------------------------------------------
def convnet_reference(raw, x):
    dn = ("NCHW", "OIHW", "NCHW")
    y = lax.conv_general_dilated(x, raw["conv1_w"], (1, 1), "VALID",
                                 dimension_numbers=dn)
    y = jnp.maximum(y + raw["conv1_b"][None, :, None, None], 0.0)
    y = lax.reduce_window(y, -jnp.inf, lax.max, (1, 1, 2, 2), (1, 1, 2, 2), "VALID")
    y = lax.conv_general_dilated(y, raw["conv2_w"], (1, 1), "VALID",
                                 dimension_numbers=dn)
    y = jnp.maximum(y + raw["conv2_b"][None, :, None, None], 0.0)
    y = lax.reduce_window(y, -jnp.inf, lax.max, (1, 1, 2, 2), (1, 1, 2, 2), "VALID")
    y = y.reshape(x.shape[0], -1)
    y = jnp.maximum(y @ raw["fc1_w"].T + raw["fc1_b"], 0.0)
    y = jnp.maximum(y @ raw["fc2_w"].T + raw["fc2_b"], 0.0)
    return y @ raw["fc3_w"].T + raw["fc3_b"]


if __name__ == "__main__":
    batch, channels, H, W = 2, 4, 16, 16
    # Dimension arithmetic (mirrors calculate_dimensions):
    # conv1(k=5): 16 -> 12 ; pool -> 6 ; conv2(k=5): -> 2 ; pool -> 1
    flat_features = 64 * 1 * 1

    key = jax.random.PRNGKey(0)
    pkey, xkey = jax.random.split(key)
    raw = init_params(pkey, channels, flat_features)
    kparams = prepare_params(raw)
    x = jax.random.normal(xkey, (batch, channels, H, W), jnp.float32)

    out = convnet_forward(kparams, x)
    jax.block_until_ready(out)
    assert out.shape == (batch, 10), out.shape

    # Loose-tolerance check vs an independent XLA reference (bf16 MXU inputs,
    # f32 accumulation inside the kernel).
    ref = convnet_reference(raw, x)
    err = float(jnp.max(jnp.abs(out - ref)))
    assert err < 5e-2, f"max abs err {err}"

    print("KERNEL_OK")
</pallas_src>

<mosaic_0001>
module attributes {stable_mosaic.version = 11 : i64} {
  func.func @_convnet_kernel(%arg0: memref<288x128xbf16, #tpu.memory_space<vmem>>, %arg1: memref<128x32xbf16, #tpu.memory_space<vmem>>, %arg2: memref<1x32xf32, #tpu.memory_space<vmem>>, %arg3: memref<800x64xbf16, #tpu.memory_space<vmem>>, %arg4: memref<1x64xf32, #tpu.memory_space<vmem>>, %arg5: memref<64x128xbf16, #tpu.memory_space<vmem>>, %arg6: memref<1x128xf32, #tpu.memory_space<vmem>>, %arg7: memref<128x64xbf16, #tpu.memory_space<vmem>>, %arg8: memref<1x64xf32, #tpu.memory_space<vmem>>, %arg9: memref<64x10xbf16, #tpu.memory_space<vmem>>, %arg10: memref<1x10xf32, #tpu.memory_space<vmem>>, %arg11: memref<2x10xf32, #tpu.memory_space<vmem>>) attributes {dimension_semantics = [], scalar_prefetch = 0 : i64, scratch_operands = 0 : i64, tpu.core_type = #tpu.core_type<tc>} {
    %c0 = arith.constant 0 : index
    %c0_0 = arith.constant 0 : index
    %0 = vector.load %arg0[%c0, %c0_0] : memref<288x128xbf16, #tpu.memory_space<vmem>>, vector<288x128xbf16>
    %c0_1 = arith.constant 0 : index
    %c0_2 = arith.constant 0 : index
    %1 = vector.load %arg1[%c0_1, %c0_2] : memref<128x32xbf16, #tpu.memory_space<vmem>>, vector<128x32xbf16>
    %cst = arith.constant dense<0.000000e+00> : vector<288x32xf32>
    %2 = tpu.matmul %0, %1, %cst {dimension_numbers = #tpu.dot_dimension_numbers<[1], [0], [0], [1], [0, 0, 1, 1], [], []>} : vector<288x128xbf16>, vector<128x32xbf16>, vector<288x32xf32> -> vector<288x32xf32>
    %c0_3 = arith.constant 0 : index
    %c0_4 = arith.constant 0 : index
    %3 = vector.load %arg2[%c0_3, %c0_4] : memref<1x32xf32, #tpu.memory_space<vmem>>, vector<1x32xf32>
    %4 = vector.broadcast %3 : vector<1x32xf32> to vector<288x32xf32>
    %5 = arith.addf %2, %4 : vector<288x32xf32>
    %cst_5 = arith.constant 0.000000e+00 : f32
    %6 = vector.broadcast %cst_5 : f32 to vector<288x32xf32>
    %7 = arith.maximumf %5, %6 : vector<288x32xf32>
    %8 = vector.extract_strided_slice %7 {offsets = [0, 0], sizes = [72, 32], strides = [1, 1]} : vector<288x32xf32> to vector<72x32xf32>
    %9 = vector.extract_strided_slice %7 {offsets = [72, 0], sizes = [72, 32], strides = [1, 1]} : vector<288x32xf32> to vector<72x32xf32>
    %10 = arith.maximumf %8, %9 : vector<72x32xf32>
    %11 = vector.extract_strided_slice %7 {offsets = [144, 0], sizes = [72, 32], strides = [1, 1]} : vector<288x32xf32> to vector<72x32xf32>
    %12 = vector.extract_strided_slice %7 {offsets = [216, 0], sizes = [72, 32], strides = [1, 1]} : vector<288x32xf32> to vector<72x32xf32>
    %13 = arith.maximumf %11, %12 : vector<72x32xf32>
    %14 = arith.maximumf %10, %13 : vector<72x32xf32>
    %15 = arith.truncf %14 : vector<72x32xf32> to vector<72x32xbf16>
    %16 = vector.extract_strided_slice %15 {offsets = [0, 0], sizes = [16, 32], strides = [1, 1]} : vector<72x32xbf16> to vector<16x32xbf16>
    %17 = vector.extract_strided_slice %15 {offsets = [2, 0], sizes = [16, 32], strides = [1, 1]} : vector<72x32xbf16> to vector<16x32xbf16>
    %18 = vector.extract_strided_slice %15 {offsets = [4, 0], sizes = [16, 32], strides = [1, 1]} : vector<72x32xbf16> to vector<16x32xbf16>
    %19 = vector.extract_strided_slice %15 {offsets = [6, 0], sizes = [16, 32], strides = [1, 1]} : vector<72x32xbf16> to vector<16x32xbf16>
    %20 = vector.extract_strided_slice %15 {offsets = [8, 0], sizes = [16, 32], strides = [1, 1]} : vector<72x32xbf16> to vector<16x32xbf16>
    %21 = vector.extract_strided_slice %15 {offsets = [12, 0], sizes = [16, 32], strides = [1, 1]} : vector<72x32xbf16> to vector<16x32xbf16>
    %22 = vector.extract_strided_slice %15 {offsets = [14, 0], sizes = [16, 32], strides = [1, 1]} : vector<72x32xbf16> to vector<16x32xbf16>
    %23 = vector.extract_strided_slice %15 {offsets = [16, 0], sizes = [16, 32], strides = [1, 1]} : vector<72x32xbf16> to vector<16x32xbf16>
    %24 = vector.extract_strided_slice %15 {offsets = [18, 0], sizes = [16, 32], strides = [1, 1]} : vector<72x32xbf16> to vector<16x32xbf16>
    %25 = vector.extract_strided_slice %15 {offsets = [20, 0], sizes = [16, 32], strides = [1, 1]} : vector<72x32xbf16> to vector<16x32xbf16>
    %26 = vector.extract_strided_slice %15 {offsets = [24, 0], sizes = [16, 32], strides = [1, 1]} : vector<72x32xbf16> to vector<16x32xbf16>
    %27 = vector.extract_strided_slice %15 {offsets = [26, 0], sizes = [16, 32], strides = [1, 1]} : vector<72x32xbf16> to vector<16x32xbf16>
    %28 = vector.extract_strided_slice %15 {offsets = [28, 0], sizes = [16, 32], strides = [1, 1]} : vector<72x32xbf16> to vector<16x32xbf16>
    %29 = vector.extract_strided_slice %15 {offsets = [30, 0], sizes = [16, 32], strides = [1, 1]} : vector<72x32xbf16> to vector<16x32xbf16>
    %30 = vector.extract_strided_slice %15 {offsets = [32, 0], sizes = [16, 32], strides = [1, 1]} : vector<72x32xbf16> to vector<16x32xbf16>
    %31 = vector.extract_strided_slice %15 {offsets = [36, 0], sizes = [16, 32], strides = [1, 1]} : vector<72x32xbf16> to vector<16x32xbf16>
    %32 = vector.extract_strided_slice %15 {offsets = [38, 0], sizes = [16, 32], strides = [1, 1]} : vector<72x32xbf16> to vector<16x32xbf16>
    %33 = vector.extract_strided_slice %15 {offsets = [40, 0], sizes = [16, 32], strides = [1, 1]} : vector<72x32xbf16> to vector<16x32xbf16>
    %34 = vector.extract_strided_slice %15 {offsets = [42, 0], sizes = [16, 32], strides = [1, 1]} : vector<72x32xbf16> to vector<16x32xbf16>
    %35 = vector.extract_strided_slice %15 {offsets = [44, 0], sizes = [16, 32], strides = [1, 1]} : vector<72x32xbf16> to vector<16x32xbf16>
    %36 = vector.extract_strided_slice %15 {offsets = [48, 0], sizes = [16, 32], strides = [1, 1]} : vector<72x32xbf16> to vector<16x32xbf16>
    %37 = vector.extract_strided_slice %15 {offsets = [50, 0], sizes = [16, 32], strides = [1, 1]} : vector<72x32xbf16> to vector<16x32xbf16>
    %38 = vector.extract_strided_slice %15 {offsets = [52, 0], sizes = [16, 32], strides = [1, 1]} : vector<72x32xbf16> to vector<16x32xbf16>
    %39 = vector.extract_strided_slice %15 {offsets = [54, 0], sizes = [16, 32], strides = [1, 1]} : vector<72x32xbf16> to vector<16x32xbf16>
    %40 = vector.extract_strided_slice %15 {offsets = [56, 0], sizes = [16, 32], strides = [1, 1]} : vector<72x32xbf16> to vector<16x32xbf16>
    %41 = tpu.concatenate %16, %17, %18, %19, %20, %21, %22, %23, %24, %25, %26, %27, %28, %29, %30, %31 in 1 : vector<16x32xbf16>, vector<16x32xbf16>, vector<16x32xbf16>, vector<16x32xbf16>, vector<16x32xbf16>, vector<16x32xbf16>, vector<16x32xbf16>, vector<16x32xbf16>, vector<16x32xbf16>, vector<16x32xbf16>, vector<16x32xbf16>, vector<16x32xbf16>, vector<16x32xbf16>, vector<16x32xbf16>, vector<16x32xbf16>, vector<16x32xbf16> -> vector<16x512xbf16>
    %42 = tpu.concatenate %32, %33, %34, %35, %36, %37, %38, %39, %40 in 1 : vector<16x32xbf16>, vector<16x32xbf16>, vector<16x32xbf16>, vector<16x32xbf16>, vector<16x32xbf16>, vector<16x32xbf16>, vector<16x32xbf16>, vector<16x32xbf16>, vector<16x32xbf16> -> vector<16x288xbf16>
    %43 = tpu.concatenate %41, %42 in 1 : vector<16x512xbf16>, vector<16x288xbf16> -> vector<16x800xbf16>
    %c0_6 = arith.constant 0 : index
    %c0_7 = arith.constant 0 : index
    %44 = vector.load %arg3[%c0_6, %c0_7] : memref<800x64xbf16, #tpu.memory_space<vmem>>, vector<800x64xbf16>
    %cst_8 = arith.constant dense<0.000000e+00> : vector<16x64xf32>
    %45 = tpu.matmul %43, %44, %cst_8 {dimension_numbers = #tpu.dot_dimension_numbers<[1], [0], [0], [1], [0, 0, 1, 1], [], []>} : vector<16x800xbf16>, vector<800x64xbf16>, vector<16x64xf32> -> vector<16x64xf32>
    %c0_9 = arith.constant 0 : index
    %c0_10 = arith.constant 0 : index
    %46 = vector.load %arg4[%c0_9, %c0_10] : memref<1x64xf32, #tpu.memory_space<vmem>>, vector<1x64xf32>
    %47 = vector.broadcast %46 : vector<1x64xf32> to vector<16x64xf32>
    %48 = arith.addf %45, %47 : vector<16x64xf32>
    %cst_11 = arith.constant 0.000000e+00 : f32
    %49 = vector.broadcast %cst_11 : f32 to vector<16x64xf32>
    %50 = arith.maximumf %48, %49 : vector<16x64xf32>
    %51 = vector.extract_strided_slice %50 {offsets = [0, 0], sizes = [2, 64], strides = [1, 1]} : vector<16x64xf32> to vector<2x64xf32>
    %52 = vector.extract_strided_slice %50 {offsets = [2, 0], sizes = [2, 64], strides = [1, 1]} : vector<16x64xf32> to vector<2x64xf32>
    %53 = vector.extract_strided_slice %50 {offsets = [12, 0], sizes = [2, 64], strides = [1, 1]} : vector<16x64xf32> to vector<2x64xf32>
    %54 = vector.extract_strided_slice %50 {offsets = [14, 0], sizes = [2, 64], strides = [1, 1]} : vector<16x64xf32> to vector<2x64xf32>
    %55 = arith.maximumf %51, %52 : vector<2x64xf32>
    %56 = arith.maximumf %55, %53 : vector<2x64xf32>
    %57 = arith.maximumf %56, %54 : vector<2x64xf32>
    %58 = arith.truncf %57 : vector<2x64xf32> to vector<2x64xbf16>
    %c0_12 = arith.constant 0 : index
    %c0_13 = arith.constant 0 : index
    %59 = vector.load %arg5[%c0_12, %c0_13] : memref<64x128xbf16, #tpu.memory_space<vmem>>, vector<64x128xbf16>
    %cst_14 = arith.constant dense<0.000000e+00> : vector<2x128xf32>
    %60 = tpu.matmul %58, %59, %cst_14 {dimension_numbers = #tpu.dot_dimension_numbers<[1], [0], [0], [1], [0, 0, 1, 1], [], []>} : vector<2x64xbf16>, vector<64x128xbf16>, vector<2x128xf32> -> vector<2x128xf32>
    %c0_15 = arith.constant 0 : index
    %c0_16 = arith.constant 0 : index
    %61 = vector.load %arg6[%c0_15, %c0_16] : memref<1x128xf32, #tpu.memory_space<vmem>>, vector<1x128xf32>
    %62 = vector.broadcast %61 : vector<1x128xf32> to vector<2x128xf32>
    %63 = arith.addf %60, %62 : vector<2x128xf32>
    %cst_17 = arith.constant 0.000000e+00 : f32
    %64 = vector.broadcast %cst_17 : f32 to vector<2x128xf32>
    %65 = arith.maximumf %63, %64 : vector<2x128xf32>
    %66 = arith.truncf %65 : vector<2x128xf32> to vector<2x128xbf16>
    %c0_18 = arith.constant 0 : index
    %c0_19 = arith.constant 0 : index
    %67 = vector.load %arg7[%c0_18, %c0_19] : memref<128x64xbf16, #tpu.memory_space<vmem>>, vector<128x64xbf16>
    %cst_20 = arith.constant dense<0.000000e+00> : vector<2x64xf32>
    %68 = tpu.matmul %66, %67, %cst_20 {dimension_numbers = #tpu.dot_dimension_numbers<[1], [0], [0], [1], [0, 0, 1, 1], [], []>} : vector<2x128xbf16>, vector<128x64xbf16>, vector<2x64xf32> -> vector<2x64xf32>
    %c0_21 = arith.constant 0 : index
    %c0_22 = arith.constant 0 : index
    %69 = vector.load %arg8[%c0_21, %c0_22] : memref<1x64xf32, #tpu.memory_space<vmem>>, vector<1x64xf32>
    %70 = vector.broadcast %69 : vector<1x64xf32> to vector<2x64xf32>
    %71 = arith.addf %68, %70 : vector<2x64xf32>
    %cst_23 = arith.constant 0.000000e+00 : f32
    %72 = vector.broadcast %cst_23 : f32 to vector<2x64xf32>
    %73 = arith.maximumf %71, %72 : vector<2x64xf32>
    %74 = arith.truncf %73 : vector<2x64xf32> to vector<2x64xbf16>
    %c0_24 = arith.constant 0 : index
    %c0_25 = arith.constant 0 : index
    %75 = vector.load %arg9[%c0_24, %c0_25] : memref<64x10xbf16, #tpu.memory_space<vmem>>, vector<64x10xbf16>
    %cst_26 = arith.constant dense<0.000000e+00> : vector<2x10xf32>
    %76 = tpu.matmul %74, %75, %cst_26 {dimension_numbers = #tpu.dot_dimension_numbers<[1], [0], [0], [1], [0, 0, 1, 1], [], []>} : vector<2x64xbf16>, vector<64x10xbf16>, vector<2x10xf32> -> vector<2x10xf32>
    %c0_27 = arith.constant 0 : index
    %c0_28 = arith.constant 0 : index
    %77 = vector.load %arg10[%c0_27, %c0_28] : memref<1x10xf32, #tpu.memory_space<vmem>>, vector<1x10xf32>
    %78 = vector.broadcast %77 : vector<1x10xf32> to vector<2x10xf32>
    %79 = arith.addf %76, %78 : vector<2x10xf32>
    %c0_29 = arith.constant 0 : index
    %c0_30 = arith.constant 0 : index
    %80 = vector.load %arg11[%c0_29, %c0_30] : memref<2x10xf32, #tpu.memory_space<vmem>>, vector<2x10xf32>
    tpu.vector_store %arg11[%c0_29, %c0_30], %79 {strides = array<i32>} : memref<2x10xf32, #tpu.memory_space<vmem>>, vector<2x10xf32>,
    return
  }
}

</mosaic_0001>

<bundles_post_ra>
// kernel: convnet_forward.1
= control target key start
LH: loop header
LB: loop body
LE: loop exit
PB: predicated region body
PF: predicated region fallthrough
CT: control target
= control target key end

     0   :  { %s2423_s0 = inlined_call_operand.vmem [shape: bf16[288,128], index: 0, kind: input, shape index: {}]   ;;  %s2424_s1 = inlined_call_operand.vmem [shape: bf16[128,32], index: 1, kind: input, shape index: {}]   ;;  %s2425_s2 = inlined_call_operand.vmem [shape: f32[1,32], index: 2, kind: input, shape index: {}]   ;;  %s2426_s3 = inlined_call_operand.vmem [shape: bf16[800,64], index: 3, kind: input, shape index: {}]   ;;  %s2427_s4 = inlined_call_operand.vmem [shape: f32[1,64], index: 4, kind: input, shape index: {}]   ;;  %s2428_s5 = inlined_call_operand.vmem [shape: bf16[64,128], index: 5, kind: input, shape index: {}]   ;;  %s2429_s6 = inlined_call_operand.vmem [shape: f32[1,128], index: 6, kind: input, shape index: {}]   ;;  %s2430_s7 = inlined_call_operand.vmem [shape: bf16[128,64], index: 7, kind: input, shape index: {}]   ;;  %s2431_s8 = inlined_call_operand.vmem [shape: f32[1,64], index: 8, kind: input, shape index: {}]   ;;  %s2432_s9 = inlined_call_operand.vmem [shape: bf16[64,10], index: 9, kind: input, shape index: {}]   ;;  %s2433_s10 = inlined_call_operand.vmem [shape: f32[1,10], index: 10, kind: input, shape index: {}]   ;;  %s2434_s11 = inlined_call_operand.hbm [shape: f32[2,10], index: 11, kind: output, shape index: {}]  }
   0x1   :  { %v1753_v0 = vld [vmem:[%s2424_s1 + $0x38] sm:$0xff]  ;;  %v1752_v1 = vld [vmem:[%s2424_s1 + $0x30] sm:$0xff] }
   0x2   :  { %252 = vmatpush.bf16.msra.mxu0 %v1753_v0  ;;  %1822 = vmatpush.bf16.msra.mxu3 %v1753_v0 }
   0x3   :  { %1821 = vmatpush.bf16.msra.mxu2 %v1753_v0  ;;  %1820 = vmatpush.bf16.msra.mxu1 %v1753_v0 }
   0x4   :  { %16 = vsyncpa [#allocation3], 0  ;;  %v1751_v2 = vld [vmem:[%s2424_s1 + $0x28] sm:$0xff]  ;;  %v1750_v3 = vld [vmem:[%s2424_s1 + $0x20] sm:$0xff]  ;;  %vm443_vm0 = vcmask 1044480   ;;  %vm431_vm1 = vcmask 1046528  }
   0x5   :  { %v1749_v4 = vld [vmem:[%s2424_s1 + $0x18] sm:$0xff]  ;;  %v1748_v5 = vld [vmem:[%s2424_s1 + $0x10] sm:$0xff]  ;;  %v1747_v6 = vld [vmem:[%s2424_s1 + $0x8] sm:$0xff]  ;;  %s1880_s30 = smov 32   ;;  %vm437_vm2 = vcmask 1045504   ;;  %s1881_s12 = smov 64  }
   0x6   :  { %253 = vmatpush.bf16.msra.mxu0 %v1752_v1  ;;  %1825 = vmatpush.bf16.msra.mxu3 %v1752_v1  ;;  %v1746_v7 = vld [vmem:[%s2424_s1] sm:$0xff]  ;;  %v1743_v9 = vld [vmem:[%s2423_s0 + $0x78] sm:$0xff]  ;;  %v1729_v11 = vld [vmem:[%s2423_s0 + $0x8] sm:$0xff]  ;;  %vm549_vm3 = vcmask 1041408   ;;  %vm557_vm4 = vcmask 1040384   ;;  %vm507_vm5 = vcmask 261120  }
   0x7   :  { %1824 = vmatpush.bf16.msra.mxu2 %v1752_v1  ;;  %1823 = vmatpush.bf16.msra.mxu1 %v1752_v1  ;;  %v1728_v8 = vld [vmem:[%s2423_s0] sm:$0xff]  ;;  %v1739_v10 = vld [vmem:[%s2423_s0 + $0x58] sm:$0xff]  ;;  %v1730_v15 = vld [vmem:[%s2423_s0 + $0x10] sm:$0xff]  ;;  %vm511_vm6 = vcmask 523264   ;;  %vm514_vm7 = vcmask 785408   ;;  %s1882_s15 = smov [#allocation2]  }
   0x8   :  { %v1744_v12 = vld [vmem:[%s2423_s0 + $0x80] sm:$0xff]  ;;  %v1745_v16 = vld [vmem:[%s2423_s0 + $0x88] sm:$0xff]  ;;  %v1731_v19 = vld [vmem:[%s2423_s0 + $0x18] sm:$0xff]  ;;  %s1347_s16 = sshll.u32 %s2434_s11, 4  ;;  %vm1338_vm8 = vcmask 74752   ;;  %s1348_s16 = int_to_ptr.hbm [resolvable:$true] %s1347_s16 }
   0x9   :  { %v1740_v13 = vld [vmem:[%s2423_s0 + $0x60] sm:$0xff]  ;;  %v1741_v17 = vld [vmem:[%s2423_s0 + $0x68] sm:$0xff]  ;;  %v1742_v20 = vld [vmem:[%s2423_s0 + $0x70] sm:$0xff] }
   0xa   :  { %254 = vmatpush.bf16.msra.mxu0 %v1751_v2  ;;  %1828 = vmatpush.bf16.msra.mxu3 %v1751_v2  ;;  %v1736_v14 = vld [vmem:[%s2423_s0 + $0x40] sm:$0xff]  ;;  %v1737_v18 = vld [vmem:[%s2423_s0 + $0x48] sm:$0xff]  ;;  %v1738_v21 = vld [vmem:[%s2423_s0 + $0x50] sm:$0xff] }
   0xb   :  { %1827 = vmatpush.bf16.msra.mxu2 %v1751_v2  ;;  %1826 = vmatpush.bf16.msra.mxu1 %v1751_v2  ;;  %v1732_v22 = vld [vmem:[%s2423_s0 + $0x20] sm:$0xff]  ;;  %v1733_v23 = vld [vmem:[%s2423_s0 + $0x28] sm:$0xff]  ;;  %v1734_v24 = vld [vmem:[%s2423_s0 + $0x30] sm:$0xff] }
   0xc   :  { %v1735_v25 = vld [vmem:[%s2423_s0 + $0x38] sm:$0xff]  ;;  %v2050_v44 = vld [vmem:[%s2425_s2] ss:$0 sm:$0xff]  ;;  %s1879_s2 = smov 96  }
   0xe   :  { %255 = vmatpush.bf16.msra.mxu0 %v1750_v3  ;;  %1831 = vmatpush.bf16.msra.mxu3 %v1750_v3 }
   0xf   :  { %1830 = vmatpush.bf16.msra.mxu2 %v1750_v3  ;;  %1829 = vmatpush.bf16.msra.mxu1 %v1750_v3 }
  0x12   :  { %256 = vmatpush.bf16.msra.mxu0 %v1749_v4  ;;  %1834 = vmatpush.bf16.msra.mxu3 %v1749_v4 }
  0x13   :  { %1833 = vmatpush.bf16.msra.mxu2 %v1749_v4  ;;  %1832 = vmatpush.bf16.msra.mxu1 %v1749_v4 }
  0x16   :  { %257 = vmatpush.bf16.msra.mxu0 %v1748_v5  ;;  %1837 = vmatpush.bf16.msra.mxu3 %v1748_v5 }
  0x17   :  { %1836 = vmatpush.bf16.msra.mxu2 %v1748_v5  ;;  %1835 = vmatpush.bf16.msra.mxu1 %v1748_v5 }
  0x1a   :  { %258 = vmatpush.bf16.msra.mxu0 %v1747_v6  ;;  %1840 = vmatpush.bf16.msra.mxu3 %v1747_v6 }
  0x1b   :  { %1839 = vmatpush.bf16.msra.mxu2 %v1747_v6  ;;  %1838 = vmatpush.bf16.msra.mxu1 %v1747_v6 }
  0x1e   :  { %259 = vmatpush.bf16.msra.mxu0 %v1746_v7  ;;  %1843 = vmatpush.bf16.msra.mxu3 %v1746_v7 }
  0x1f   :  { %1842 = vmatpush.bf16.msra.mxu2 %v1746_v7  ;;  %1841 = vmatpush.bf16.msra.mxu1 %v1746_v7 }
  0x21   :  { %260 = vmatmul.bf16.vlgmr.msra.gmra.mxu0 %v1728_v8  ;;  %335 = vmatmul.bf16.vlgmr.msra.gmra.mxu3 %v1743_v9 }
  0x22   :  { %315 = vmatmul.bf16.vlgmr.msra.gmra.mxu2 %v1739_v10  ;;  %300 = vmatmul.bf16.vlgmr.msra.gmra.mxu1 %v1736_v14 }
  0x31   :  { %265 = vmatmul.bf16.gmra.mxu0 %v1729_v11  ;;  %340 = vmatmul.bf16.gmra.mxu3 %v1744_v12 }
  0x32   :  { %320 = vmatmul.bf16.gmra.mxu2 %v1740_v13  ;;  %305 = vmatmul.bf16.gmra.mxu1 %v1737_v18 }
  0x41   :  { %270 = vmatmul.bf16.gmra.mxu0 %v1730_v15  ;;  %345 = vmatmul.bf16.gmra.mxu3 %v1745_v16 }
  0x42   :  { %325 = vmatmul.bf16.gmra.mxu2 %v1741_v17  ;;  %310 = vmatmul.bf16.gmra.mxu1 %v1738_v21 }
  0x51   :  { %275 = vmatmul.bf16.gmra.mxu0 %v1731_v19 }
  0x52   :  { %330 = vmatmul.bf16.gmra.mxu2 %v1742_v20 }
  0x61   :  { %280 = vmatmul.bf16.gmra.mxu0 %v1732_v22 }
  0x71   :  { %285 = vmatmul.bf16.gmra.mxu0 %v1733_v23 }
  0x81   :  { %290 = vmatmul.bf16.gmra.mxu0 %v1734_v24 }
  0x91   :  { %295 = vmatmul.bf16.gmra.mxu0 %v1735_v25 }
  0x9e   :  { %v261_v26 = vpop.f32.mrf.mxu0 }
  0x9f   :  { %v301_v39 = vpop.f32.mrf.mxu1  ;;  %v262_v11 = vadd.f32 %v2050_v44, %v261_v26 }
  0xa0   :  { %v302_v46 = vadd.f32 %v2050_v44, %v301_v39 }
  0xa1   :  { %v351_v21 = vmax.f32 %v262_v11, 0.0 }
  0xa2   :  { %v367_v51 = vmax.f32 %v302_v46, 0.0 }
  0xa4   :  { %v2023_v28 = vpop.f32.mrf.mxu3 }
  0xa5   :  { %v2025_v29 = vpop.f32.mrf.mxu2 }
  0xa6   :  { %v2021_v27 = vpop.f32.mrf.mxu0 }
  0xa7   :  { %v303_v43 = vpop.f32.mrf.mxu1  ;;  %v264_v39 = vadd.f32 %v2050_v44, %v2021_v27 }
  0xa8   :  { %v304_v63 = vadd.f32 %v2050_v44, %v303_v43 }
  0xaa   :  { %v368_v4 = vmax.f32 %v304_v63, 0.0 }
  0xac   :  { %v2029_v31 = vpop.f32.mrf.mxu3 }
  0xad   :  { %v2031_v32 = vpop.f32.mrf.mxu2 }
  0xae   :  { %v2027_v30 = vpop.f32.mrf.mxu0 }
  0xaf   :  { %v306_v58 = vpop.f32.mrf.mxu1  ;;  %v267_v27 = vadd.f32 %v2050_v44, %v2027_v30 }
  0xb0   :  { %v307_v12 = vadd.f32 %v2050_v44, %v306_v58 }
  0xb2   :  { %v369_v22 = vmax.f32 %v307_v12, 0.0 }
  0xb4   :  { %v2035_v34 = vpop.f32.mrf.mxu3 }
  0xb5   :  { %v2039_v36 = vpop.f32.mrf.mxu2 }
  0xb6   :  { %v2033_v33 = vpop.f32.mrf.mxu0 }
  0xb7   :  { %v308_v8 = vpop.f32.mrf.mxu1 }
  0xb8   :  { %v309_v25 = vadd.f32 %v2050_v44, %v308_v8 }
  0xba   :  { %v370_v46 = vmax.f32 %v309_v25, 0.0 }
  0xbc   :  { %v2041_v37 = vpop.f32.mrf.mxu3 }
  0xbd   :  { %v323_v40 = vpop.f32.mrf.mxu2 }
  0xbe   :  { %v2037_v35 = vpop.f32.mrf.mxu0  ;;  %v324_v47 = vadd.f32 %v2050_v44, %v323_v40 }
  0xbf   :  { %v311_v43 = vpop.f32.mrf.mxu1 }
  0xc0   :  { %v376_v52 = vmax.f32 %v324_v47, 0.0 }
  0xc4   :  { %v346_v42 = vpop.f32.mrf.mxu3 }
  0xc5   :  { %v326_v45 = vpop.f32.mrf.mxu2  ;;  %v347_v48 = vadd.f32 %v2050_v44, %v346_v42 }
  0xc6   :  { %v2043_v38 = vpop.f32.mrf.mxu0  ;;  %v327_v56 = vadd.f32 %v2050_v44, %v326_v45 }
  0xc7   :  { %v385_v53 = vmax.f32 %v347_v48, 0.0 }
  0xc8   :  { %v377_v0 = vmax.f32 %v327_v56, 0.0 }
  0xc9   :  { %v403_v59 = vmax.f32 %v376_v52, %v385_v53 }
  0xcc   :  { %v348_v50 = vpop.f32.mrf.mxu3 }
  0xcd   :  { %v349_v57 = vadd.f32 %v2050_v44, %v348_v50  ;;  %v328_v61 = vpop.f32.mrf.mxu2  ;;  %v352_v50 = vmax.f32 %v264_v39, 0.0 }
  0xce   :  { %v2045_v41 = vpop.f32.mrf.mxu0  ;;  %v329_v15 = vadd.f32 %v2050_v44, %v328_v61 }
  0xcf   :  { %v386_v1 = vmax.f32 %v349_v57, 0.0 }
  0xd0   :  { %v378_v23 = vmax.f32 %v329_v15, 0.0 }
  0xd1   :  { %v404_v6 = vmax.f32 %v377_v0, %v386_v1  ;;  %v313_v0 = vpop.f32.mrf.mxu1  ;;  %v353_v1 = vmax.f32 %v267_v27, 0.0 }
  0xd2   :  { %v396_v45 = vmax.f32 %v369_v22, %v378_v23  ;;  %v314_v8 = vadd.f32 %v2050_v44, %v313_v0 }
  0xd5   :  { %v331_v14 = vpop.f32.mrf.mxu2 }
  0xd6   :  { %v278_v49 = vpop.f32.mrf.mxu0  ;;  %v332_v26 = vadd.f32 %v2050_v44, %v331_v14  ;;  %v372_v14 = vmax.f32 %v314_v8, 0.0 }
  0xd7   :  { %v279_v54 = vadd.f32 %v2050_v44, %v278_v49 }
  0xd8   :  { %v379_v47 = vmax.f32 %v332_v26, 0.0  ;;  %v272_v26 = vadd.f32 %v2050_v44, %v2037_v35 }
  0xd9   :  { %v358_v55 = vmax.f32 %v279_v54, 0.0 }
  0xda   :  { %v397_v53 = vmax.f32 %v370_v46, %v379_v47  ;;  %v355_v35 = vmax.f32 %v272_v26, 0.0 }
  0xdb   :  { %v394_v60 = vmax.f32 %v358_v55, %v367_v51  ;;  %v312_v55 = vadd.f32 %v2050_v44, %v311_v43 }
  0xdd   :  { %v412_v62 = vmax.f32 %v394_v60, %v403_v59  ;;  %v333_v49 = vpop.f32.mrf.mxu2  ;;  %v371_v61 = vmax.f32 %v312_v55, 0.0  ;;  %v342_v55 = vadd.f32 %v2050_v44, %v2035_v34 }
  0xde   :  { %v281_v2 = vpop.f32.mrf.mxu0  ;;  %v334_v56 = vadd.f32 %v2050_v44, %v333_v49 }
  0xdf   :  { %v282_v3 = vadd.f32 %v2050_v44, %v281_v2  ;;  %v421_v9 = vpack.c.bf16 %v412_v62, %v412_v62  ;;  %v383_v0 = vmax.f32 %v342_v55, 0.0 }
  0xe0   :  { %v380_v62 = vmax.f32 %v334_v56, 0.0 }
  0xe1   :  { %v359_v5 = vmax.f32 %v282_v3, 0.0  ;;  %v2064_v18 = vunpack.c.l.b16 %v421_v9  ;;  %v269_v9 = vadd.f32 %v2050_v44, %v2033_v33 }
  0xe3   :  { %v395_v7 = vmax.f32 %v359_v5, %v368_v4  ;;  %v337_v5 = vadd.f32 %v2050_v44, %v2023_v28  ;;  %v317_v28 = vadd.f32 %v2050_v44, %v2025_v29 }
  0xe5   :  { %v413_v10 = vmax.f32 %v395_v7, %v404_v6  ;;  %v398_v7 = vmax.f32 %v371_v61, %v380_v62  ;;  %v381_v12 = vmax.f32 %v337_v5, 0.0 }
  0xe6   :  { %v283_v13 = vpop.f32.mrf.mxu0 }
  0xe7   :  { %v422_v16 = vpack.c.bf16 %v413_v10, %v413_v10  ;;  %v284_v17 = vadd.f32 %v2050_v44, %v283_v13  ;;  %v399_v23 = vmax.f32 %v372_v14, %v381_v12 }
  0xe9   :  { %v2066_v19 = vunpack.c.l.b16 %v422_v16  ;;  %v360_v20 = vmax.f32 %v284_v17, 0.0  ;;  %v354_v16 = vmax.f32 %v269_v9, 0.0  ;;  %v322_v9 = vadd.f32 %v2050_v44, %v2039_v36 }
  0xeb   :  { %v588_v24 = vpack.c.b16 %v2066_v19, %v2064_v18  ;;  %v387_v40 = vmax.f32 %v351_v21, %v360_v20  ;;  %v339_v21 = vadd.f32 %v2050_v44, %v2029_v31  ;;  %v569_v55 = vpack.c.b16 %v2066_v19, %v2066_v19 }
  0xed   :  { %v405_v51 = vmax.f32 %v387_v40, %v396_v45  ;;  %v373_v45 = vmax.f32 %v317_v28, 0.0  ;;  %v382_v46 = vmax.f32 %v339_v21, 0.0  ;;  %v375_v21 = vmax.f32 %v322_v9, 0.0 }
  0xee   :  { %v286_v42 = vpop.f32.mrf.mxu0 }
  0xef   :  { %v287_v48 = vadd.f32 %v2050_v44, %v286_v42  ;;  %v414_v57 = vpack.c.bf16 %v405_v51, %v405_v51 }
  0xf1   :  { %v361_v52 = vmax.f32 %v287_v48, 0.0  ;;  %v425_v2 = vunpack.c.l.b16 %v414_v57 }
  0xf3   :  { %v388_v54 = vmax.f32 %v352_v50, %v361_v52 }
  0xf5   :  { %v406_v58 = vmax.f32 %v388_v54, %v397_v53  ;;  %v400_v53 = vmax.f32 %v373_v45, %v382_v46  ;;  %v319_v54 = vadd.f32 %v2050_v44, %v2031_v32 }
  0xf6   :  { %v288_v59 = vpop.f32.mrf.mxu0 }
  0xf7   :  { %v415_v60 = vpack.c.bf16 %v406_v58, %v406_v58  ;;  %v289_v63 = vadd.f32 %v2050_v44, %v288_v59  ;;  %v274_v59 = vadd.f32 %v2050_v44, %v2043_v38  ;;  %v374_v32 = vmax.f32 %v319_v54, 0.0 }
  0xf9   :  { %v426_v3 = vunpack.c.l.b16 %v415_v60  ;;  %v362_v4 = vmax.f32 %v289_v63, 0.0  ;;  %v356_v5 = vmax.f32 %v274_v59, 0.0  ;;  %v401_v8 = vmax.f32 %v374_v32, %v383_v0  ;;  %v1769_v59 = vld [vmem:[%s2426_s3 + $0x78] sm:$0xff] }
  0xfa   :  { %v571_v32 = vrot.slane %v569_v55, 6  ;;  %1051 = vmatpush.bf16.msrb.mxu2 %v1769_v59 }
  0xfb   :  { %v2082_v6 = vpack.c.b16 %v426_v3, %v425_v2  ;;  %v389_v30 = vmax.f32 %v353_v1, %v362_v4 }
  0xfd   :  { %v407_v10 = vmax.f32 %v389_v30, %v398_v7  ;;  %v444_v39 = vrot.slane %v2082_v6, 3  ;;  %v432_v43 = vrot.slane %v2082_v6, 1  ;;  %v438_v63 = vrot.slane %v2082_v6, 2 }
  0xfe   :  { %v291_v11 = vpop.f32.mrf.mxu0 }
  0xff   :  { %v416_v13 = vpack.c.bf16 %v407_v10, %v407_v10  ;;  %v292_v15 = vadd.f32 %v2050_v44, %v291_v11  ;;  %v344_v11 = vadd.f32 %v2050_v44, %v2041_v37 }
 0x101   :  { %v429_v17 = vunpack.c.l.b16 %v416_v13  ;;  %v363_v20 = vmax.f32 %v292_v15, 0.0 }
 0x103   :  { %v2092_v22 = vpack.c.b16 %v429_v17, %v426_v3  ;;  %v390_v33 = vmax.f32 %v354_v16, %v363_v20  ;;  %v430_v25 = vpack.c.b16 %v429_v17, %v429_v17  ;;  %v277_v16 = vadd.f32 %v2050_v44, %v2045_v41 }
 0x105   :  { %v408_v40 = vmax.f32 %v390_v33, %v399_v23  ;;  %v445_v42 = vrot.slane %v430_v25, 3  ;;  %v433_v29 = vrot.slane %v430_v25, 1  ;;  %v439_v58 = vrot.slane %v430_v25, 2 }
 0x106   :  { %v293_v31 = vpop.f32.mrf.mxu0  ;;  %v453_v61 = vrot.slane %v2092_v22, 2  ;;  %v458_v10 = vrot.slane %v2092_v22, 3  ;;  %v384_v25 = vmax.f32 %v344_v11, 0.0 }
 0x107   :  { %v417_v47 = vpack.c.bf16 %v408_v40, %v408_v40  ;;  %v294_v48 = vadd.f32 %v2050_v44, %v293_v31  ;;  %v446_v49 = vsel %vm443_vm0, %v444_v39, %v445_v42  ;;  %v434_v50 = vsel %vm431_vm1, %v432_v43, %v433_v29 }
 0x108   :  { %447 = vrot.lane.b32.xlu1 %v446_v49, %s1879_s2  ;;  %435 = vrot.lane.b32.xlu0 %v434_v50, %s1880_s30  ;;  %v440_v4 = vsel %vm437_vm2, %v438_v63, %v439_v58  ;;  %v357_v40 = vmax.f32 %v277_v16, 0.0  ;;  %v402_v29 = vmax.f32 %v375_v21, %v384_v25  ;;  %v1761_v58 = vld [vmem:[%s2426_s3 + $0x38] sm:$0xff]  ;;  %v1768_v16 = vld [vmem:[%s2426_s3 + $0x70] sm:$0xff] }
 0x109   :  { %v451_v51 = vunpack.c.l.b16 %v417_v47  ;;  %v364_v52 = vmax.f32 %v294_v48, 0.0  ;;  %1037 = vmatpush.bf16.msrb.mxu1 %v1761_v58  ;;  %1052 = vmatpush.bf16.msrb.mxu2 %v1768_v16  ;;  %v1755_v21 = vld [vmem:[%s2426_s3 + $0x8] sm:$0xff]  ;;  %v1765_v25 = vld [vmem:[%s2426_s3 + $0x58] sm:$0xff]  ;;  %v1786_v16 = vld [vmem:[%s2426_s3 + $0x100] sm:$0xff] }
 0x10b   :  { %v391_v56 = vmax.f32 %v355_v35, %v364_v52  ;;  %v463_v27 = vpack.c.b16 %v451_v51, %v429_v17  ;;  %v452_v57 = vpack.c.b16 %v451_v51, %v451_v51 }
 0x10d   :  { %v409_v60 = vmax.f32 %v391_v56, %v400_v53  ;;  %464 = vrot.lane.b32.xlu2 %v463_v27, %s1879_s2  ;;  %v454_v62 = vrot.slane %v452_v57, 2  ;;  %v459_v38 = vrot.slane %v452_v57, 3  ;;  %v472_v20 = vrot.slane %v463_v27, 2 }
 0x10e   :  { %v296_v1 = vpop.f32.mrf.mxu0  ;;  %v469_v23 = vrot.slane %v463_v27, 1  ;;  %v548_v56 = vpack.c.b16 %v2064_v18, %v2064_v18 }
 0x10f   :  { %v418_v34 = vpack.c.bf16 %v409_v60, %v409_v60  ;;  %v297_v2 = vadd.f32 %v2050_v44, %v296_v1  ;;  %v455_v3 = vsel %vm437_vm2, %v453_v61, %v454_v62  ;;  %v460_v15 = vsel %vm443_vm0, %v458_v10, %v459_v38  ;;  %v1760_v62 = vld [vmem:[%s2426_s3 + $0x30] sm:$0xff] }
 0x110   :  { %456 = vrot.lane.b32.xlu1 %v455_v3, %s1880_s30  ;;  %441 = vrot.lane.b32.xlu0 %v440_v4, %s1881_s12  ;;  %v551_v63 = vrot.slane %v548_v56, 6  ;;  %v559_v4 = vrot.slane %v548_v56, 7  ;;  %v578_v38 = vrot.slane %v569_v55, 7  ;;  %v1791_v56 = vld [vmem:[%s2426_s3 + $0x128] sm:$0xff] }
 0x111   :  { %v467_v7 = vunpack.c.l.b16 %v418_v34  ;;  %v365_v30 = vmax.f32 %v297_v2, 0.0  ;;  %1038 = vmatpush.bf16.msrb.mxu1 %v1760_v62  ;;  %v1790_v62 = vld [vmem:[%s2426_s3 + $0x120] sm:$0xff] }
 0x113   :  { %v392_v12 = vmax.f32 %v356_v5, %v365_v30  ;;  %v477_v13 = vpack.c.b16 %v467_v7, %v451_v51  ;;  %v468_v14 = vpack.c.b16 %v467_v7, %v467_v7 }
 0x115   :  { %v410_v17 = vmax.f32 %v392_v12, %v401_v8  ;;  %461 = vrot.lane.b32.xlu2 %v460_v15, %s1881_s12  ;;  %v473_v28 = vrot.slane %v468_v14, 2  ;;  %v470_v33 = vrot.slane %v468_v14, 1  ;;  %v483_v47 = vrot.slane %v477_v13, 1  ;;  %v1759_v8 = vld [vmem:[%s2426_s3 + $0x28] sm:$0xff]  ;;  %v1758_v12 = vld [vmem:[%s2426_s3 + $0x20] sm:$0xff]  ;;  %v1757_v15 = vld [vmem:[%s2426_s3 + $0x18] sm:$0xff] }
 0x116   :  { %v298_v36 = vpop.f32.mrf.mxu0  ;;  %v491_v49 = vrot.slane %v477_v13, 3  ;;  %v488_v35 = vrot.slane %v477_v13, 2  ;;  %1039 = vmatpush.bf16.msrb.mxu1 %v1759_v8 }
 0x117   :  { %v419_v26 = vpack.c.bf16 %v410_v17, %v410_v17  ;;  %v299_v37 = vadd.f32 %v2050_v44, %v298_v36  ;;  %v474_v39 = vsel %vm437_vm2, %v472_v20, %v473_v28  ;;  %v2131_v41 = vsel %vm431_vm1, %v469_v23, %v470_v33  ;;  %v1777_v17 = vld [vmem:[%s2426_s3 + $0xb8] sm:$0xff]  ;;  %v1756_v20 = vld [vmem:[%s2426_s3 + $0x10] sm:$0xff]  ;;  %v1767_v28 = vld [vmem:[%s2426_s3 + $0x68] sm:$0xff] }
 0x118   :  { %478 = vrot.lane.b32.xlu1 %v477_v13, %s1881_s12  ;;  %475 = vrot.lane.b32.xlu0 %v474_v39, %s1880_s30  ;;  %v1766_v36 = vld [vmem:[%s2426_s3 + $0x60] sm:$0xff]  ;;  %v1776_v23 = vld [vmem:[%s2426_s3 + $0xb0] sm:$0xff] }
 0x119   :  { %v481_v42 = vunpack.c.l.b16 %v419_v26  ;;  %v366_v43 = vmax.f32 %v299_v37, 0.0  ;;  %1065 = vmatpush.bf16.msrb.mxu3 %v1777_v17  ;;  %1053 = vmatpush.bf16.msrb.mxu2 %v1767_v28  ;;  %v1754_v33 = vld [vmem:[%s2426_s3] sm:$0xff]  ;;  %v1775_v26 = vld [vmem:[%s2426_s3 + $0xa8] sm:$0xff]  ;;  %v1785_v37 = vld [vmem:[%s2426_s3 + $0xf8] sm:$0xff] }
 0x11a   :  { %1040 = vmatpush.bf16.msrb.mxu1 %v1758_v12  ;;  %v1764_v39 = vld [vmem:[%s2426_s3 + $0x50] sm:$0xff]  ;;  %v1797_v12 = vld [vmem:[%s2426_s3 + $0x158] sm:$0xff] }
 0x11b   :  { %v482_v45 = vpack.c.b16 %v481_v42, %v481_v42  ;;  %v393_v46 = vmax.f32 %v357_v40, %v366_v43  ;;  %v2133_v31 = vpack.c.b16 %v481_v42, %v467_v7  ;;  %v1774_v40 = vld [vmem:[%s2426_s3 + $0xa0] sm:$0xff]  ;;  %v1763_v43 = vld [vmem:[%s2426_s3 + $0x48] sm:$0xff]  ;;  %v1796_v17 = vld [vmem:[%s2426_s3 + $0x150] sm:$0xff] }
 0x11d   :  { %v411_v48 = vmax.f32 %v393_v46, %v402_v29  ;;  %v484_v44 = vrot.slane %v482_v45, 1  ;;  %v492_v50 = vrot.slane %v482_v45, 3  ;;  %v489_v51 = vrot.slane %v482_v45, 2  ;;  %1054 = vmatpush.bf16.msrb.mxu2 %v1766_v36  ;;  %1066 = vmatpush.bf16.msrb.mxu3 %v1776_v23  ;;  %v1773_v29 = vld [vmem:[%s2426_s3 + $0x98] sm:$0xff]  ;;  %v1783_v45 = vld [vmem:[%s2426_s3 + $0xe8] sm:$0xff]  ;;  %v1762_v46 = vld [vmem:[%s2426_s3 + $0x40] sm:$0xff] }
 0x11e   :  { %v502_v13 = vrot.slane %v2133_v31, 2  ;;  %1041 = vmatpush.bf16.msrb.mxu1 %v1757_v15  ;;  %v1795_v36 = vld [vmem:[%s2426_s3 + $0x148] sm:$0xff] }
 0x11f   :  { %v420_v52 = vpack.c.bf16 %v411_v48, %v411_v48  ;;  %v485_v53 = vsel %vm431_vm1, %v483_v47, %v484_v44  ;;  %v493_v54 = vsel %vm443_vm0, %v491_v49, %v492_v50  ;;  %v2145_v27 = vsel %vm437_vm2, %v488_v35, %v489_v51  ;;  %v1772_v47 = vld [vmem:[%s2426_s3 + $0x90] sm:$0xff]  ;;  %v1782_v48 = vld [vmem:[%s2426_s3 + $0xe0] sm:$0xff]  ;;  %v1771_v44 = vld [vmem:[%s2426_s3 + $0x88] sm:$0xff] }
 0x120   :  { %486 = vrot.lane.b32.xlu2 %v485_v53, %s1879_s2  ;;  %497 = vrot.lane.b32.xlu1 %v2133_v31, %s1881_s12  ;;  %v1781_v49 = vld [vmem:[%s2426_s3 + $0xd8] sm:$0xff]  ;;  %v1770_v50 = vld [vmem:[%s2426_s3 + $0x80] sm:$0xff] }
 0x121   :  { %v500_v57 = vunpack.c.l.b16 %v420_v52  ;;  %494 = vrot.lane.b32.xlu0 %v493_v54, %s1880_s30  ;;  %1055 = vmatpush.bf16.msrb.mxu2 %v1765_v25  ;;  %v1780_v35 = vld [vmem:[%s2426_s3 + $0xd0] sm:$0xff]  ;;  %v1779_v51 = vld [vmem:[%s2426_s3 + $0xc8] sm:$0xff]  ;;  %v1793_v53 = vld [vmem:[%s2426_s3 + $0x138] sm:$0xff] }
 0x122   :  { %1042 = vmatpush.bf16.msrb.mxu1 %v1756_v20  ;;  %1067 = vmatpush.bf16.msrb.mxu3 %v1775_v26  ;;  %v1778_v54 = vld [vmem:[%s2426_s3 + $0xc0] sm:$0xff] }
 0x123   :  { %v2155_v60 = vpack.c.b16 %v2064_v18, %v500_v57  ;;  %v542_v61 = vpack.c.b16 %v500_v57, %v481_v42  ;;  %v2162_v5 = vpack.c.b16 %v500_v57, %v500_v57  ;;  %v1784_v42 = vld [vmem:[%s2426_s3 + $0xf0] sm:$0xff]  ;;  %v1801_v57 = vld [vmem:[%s2426_s3 + $0x178] sm:$0xff]  ;;  %v1794_v25 = vld [vmem:[%s2426_s3 + $0x140] sm:$0xff] }
 0x125   :  { %v570_v0 = vrot.slane %v2155_v60, 6  ;;  %v550_v1 = vrot.slane %v542_v61, 6  ;;  %v543_v34 = vrot.slane %v542_v61, 5  ;;  %v577_v2 = vrot.slane %v2155_v60, 7  ;;  %1056 = vmatpush.bf16.msrb.mxu2 %v1764_v39 }
 0x126   :  { %v558_v3 = vrot.slane %v542_v61, 7  ;;  %v503_v11 = vrot.slane %v2162_v5, 2  ;;  %1043 = vmatpush.bf16.msrb.mxu1 %v1755_v21  ;;  %1068 = vmatpush.bf16.msrb.mxu3 %v1774_v40 }
 0x127   :  { %v552_v7 = vsel %vm549_vm3, %v550_v1, %v551_v63  ;;  %v572_v30 = vsel %vm549_vm3, %v570_v0, %v571_v32  ;;  %v579_v10 = vsel %vm557_vm4, %v577_v2, %v578_v38  ;;  %v1800_v63 = vld [vmem:[%s2426_s3 + $0x170] sm:$0xff]  ;;  %v1789_v32 = vld [vmem:[%s2426_s3 + $0x118] sm:$0xff]  ;;  %v1803_v38 = vld [vmem:[%s2426_s3 + $0x188] sm:$0xff] }
 0x128   :  { %573 = vrot.lane.b32.xlu2 %v570_v0, %s1880_s30  ;;  %553 = vrot.lane.b32.xlu1 %v550_v1, %s1881_s12  ;;  %v560_v9 = vsel %vm557_vm4, %v558_v3, %v559_v4  ;;  %v504_v14 = vsel %vm437_vm2, %v502_v13, %v503_v11  ;;  %v1799_v0 = vld [vmem:[%s2426_s3 + $0x168] sm:$0xff] }
 0x129   :  { %544 = vrot.lane.b32.xlu0 %v543_v34, %s1880_s30  ;;  %1057 = vmatpush.bf16.msrb.mxu2 %v1763_v43  ;;  %v1787_v11 = vld [vmem:[%s2426_s3 + $0x108] sm:$0xff] }
 0x12a   :  { %1044 = vmatpush.bf16.msrb.mxu1 %v1754_v33  ;;  %1069 = vmatpush.bf16.msrb.mxu3 %v1773_v29 }
 0x12d   :  { %1058 = vmatpush.bf16.msrb.mxu2 %v1762_v46 }
 0x12e   :  { %1079 = vmatpush.bf16.msra.mxu1 %v1785_v37  ;;  %1070 = vmatpush.bf16.msrb.mxu3 %v1772_v47 }
 0x130   :  { %505 = vrot.lane.b32.xlu2 %v504_v14, %s1879_s2  ;;  %580 = vrot.lane.b32.xlu1 %v577_v2, %s1881_s12 }
 0x131   :  { %561 = vrot.lane.b32.xlu0 %v558_v3, %s1879_s2  ;;  %1093 = vmatpush.bf16.msra.mxu2 %v1793_v53 }
 0x132   :  { %1080 = vmatpush.bf16.msra.mxu1 %v1784_v42  ;;  %1071 = vmatpush.bf16.msrb.mxu3 %v1771_v44 }
 0x136   :  { %1081 = vmatpush.bf16.msra.mxu1 %v1783_v45  ;;  %1072 = vmatpush.bf16.msrb.mxu3 %v1770_v50 }
 0x138   :  { %555 = vrot.lane.b32.xlu2 %v552_v7, %s1881_s12  ;;  %563 = vrot.lane.b32.xlu1 %v560_v9, %s1879_s2  ;;  %v1788_v7 = vld [vmem:[%s2426_s3 + $0x110] sm:$0xff] }
 0x139   :  { %575 = vrot.lane.b32.xlu0 %v572_v30, %s1880_s30  ;;  %v1798_v30 = vld [vmem:[%s2426_s3 + $0x160] sm:$0xff] }
 0x13a   :  { %1082 = vmatpush.bf16.msra.mxu1 %v1782_v48  ;;  %1107 = vmatpush.bf16.msra.mxu3 %v1801_v57 }
 0x13e   :  { %1083 = vmatpush.bf16.msra.mxu1 %v1781_v49  ;;  %1108 = vmatpush.bf16.msra.mxu3 %v1800_v63 }
 0x140   :  { %582 = vrot.lane.b32.xlu2 %v579_v10, %s1881_s12  ;;  %586 = vrot.lane.b32.xlu1 %v569_v55, %s1879_s2  ;;  %v1792_v55 = vld [vmem:[%s2426_s3 + $0x130] sm:$0xff]  ;;  %v1802_v10 = vld [vmem:[%s2426_s3 + $0x180] sm:$0xff] }
 0x141   :  { %584 = vrot.lane.b32.xlu0 %v2155_v60, %s1879_s2  ;;  %1094 = vmatpush.bf16.msra.mxu2 %v1792_v55 }
 0x142   :  { %1084 = vmatpush.bf16.msra.mxu1 %v1780_v35  ;;  %1109 = vmatpush.bf16.msra.mxu3 %v1799_v0 }
 0x145   :  { %1095 = vmatpush.bf16.msra.mxu2 %v1791_v56 }
 0x146   :  { %1085 = vmatpush.bf16.msra.mxu1 %v1779_v51  ;;  %1110 = vmatpush.bf16.msra.mxu3 %v1798_v30 }
 0x149   :  { %1096 = vmatpush.bf16.msra.mxu2 %v1790_v62 }
 0x14a   :  { %1086 = vmatpush.bf16.msra.mxu1 %v1778_v54  ;;  %1111 = vmatpush.bf16.msra.mxu3 %v1797_v12 }
 0x14d   :  { %1097 = vmatpush.bf16.msra.mxu2 %v1789_v32  ;;  %v1807_v32 = vld [vmem:[%s2428_s5 + $0x18] sm:$0xff] }
 0x14e   :  { %1112 = vmatpush.bf16.msra.mxu3 %v1796_v17 }
 0x151   :  { %1098 = vmatpush.bf16.msra.mxu2 %v1788_v7  ;;  %v1804_v7 = vld [vmem:[%s2428_s5] sm:$0xff] }
 0x152   :  { %1113 = vmatpush.bf16.msra.mxu3 %v1795_v36 }
 0x155   :  { %1099 = vmatpush.bf16.msra.mxu2 %v1787_v11  ;;  %v1814_v11 = vld [vmem:[%s2430_s7 + $0x30] sm:$0xff] }
 0x156   :  { %1114 = vmatpush.bf16.msra.mxu3 %v1794_v25 }
 0x159   :  { %1100 = vmatpush.bf16.msra.mxu2 %v1786_v16 }
 0x167   :  { %v465_v52 = vpop.permute.xlu2 %464 }
 0x16f   :  { %v462_v58 = vpop.permute.xlu2 %461 }
 0x17a   :  { %v448_v59 = vpop.permute.xlu1 %447  ;;  %v436_v61 = vpop.permute.xlu0 %435 }
 0x17b   :  { %v487_v1 = vpop.permute.xlu2 %486  ;;  %v510_v2 = vsel %vm507_vm5, %v2082_v6, %v436_v61 }
 0x182   :  { %v457_v34 = vpop.permute.xlu1 %456  ;;  %v442_v4 = vpop.permute.xlu0 %441 }
 0x183   :  { %v520_v3 = vsel %vm507_vm5, %v2092_v22, %v457_v34  ;;  %v513_v8 = vsel %vm511_vm6, %v510_v2, %v442_v4  ;;  %v574_v14 = vpop.permute.xlu2 %573  ;;  %v1849_v4 = vld [vmem:[%s2427_s4] ss:$0 sm:$0xff]  ;;  %s1345_s4 = sshll.u32 %s1882_s15, 4  ;;  %s1346_s4 = int_to_ptr.vmem [resolvable:$true] %s1345_s4 }
 0x184   :  { %v522_v6 = vsel %vm511_vm6, %v520_v3, %v462_v58  ;;  %v516_v9 = vsel %vm514_vm7, %v513_v8, %v448_v59  ;;  %v1805_v3 = vld [vmem:[%s2428_s5 + $0x8] sm:$0xff] }
 0x185   :  { %v524_v22 = vsel %vm514_vm7, %v522_v6, %v465_v52  ;;  %1045 = vmatmul.bf16.vlgmr.msrb.gmra.mxu1 %v516_v9  ;;  %v566_v52 = vrot.slane %v2155_v60, 5  ;;  %v1815_v9 = vld [vmem:[%s2430_s7 + $0x38] sm:$0xff] }
 0x186   :  { %1059 = vmatmul.bf16.vlgmr.msrb.gmra.mxu2 %v524_v22  ;;  %1127 = vmatpush.bf16.msrb.mxu1 %v1803_v38 }
 0x187   :  { %1192 = vmatpush.bf16.msrb.mxu2 %v1807_v32  ;;  %v1852_v32 = vld [vmem:[%s2433_s10] ss:$0 sm:$0xff] }
 0x18a   :  { %v479_v13 = vpop.permute.xlu1 %478  ;;  %v476_v15 = vpop.permute.xlu0 %475  ;;  %1128 = vmatpush.bf16.msrb.mxu1 %v1802_v10 }
 0x18b   :  { %v528_v20 = vsel %vm507_vm5, %v2131_v41, %v476_v15  ;;  %v506_v26 = vpop.permute.xlu2 %505  ;;  %v1813_v15 = vld [vmem:[%s2430_s7 + $0x28] sm:$0xff] }
 0x18c   :  { %v530_v28 = vsel %vm511_vm6, %v528_v20, %v479_v13 }
 0x18d   :  { %v532_v21 = vsel %vm514_vm7, %v530_v28, %v487_v1  ;;  %v1806_v1 = vld [vmem:[%s2428_s5 + $0x10] sm:$0xff] }
 0x18e   :  { %1073 = vmatmul.bf16.vlgmr.msrb.gmra.mxu3 %v532_v21  ;;  %1193 = vmatpush.bf16.msrb.mxu2 %v1806_v1 }
 0x18f   :  { %1271 = vmatpush.bf16.msrb.mxu3 %v1815_v9 }
 0x192   :  { %v498_v23 = vpop.permute.xlu1 %497  ;;  %1194 = vmatpush.bf16.msrb.mxu2 %v1805_v3 }
 0x193   :  { %v495_v33 = vpop.permute.xlu0 %494  ;;  %v556_v46 = vpop.permute.xlu2 %555  ;;  %1272 = vmatpush.bf16.msrb.mxu3 %v1814_v11 }
 0x194   :  { %v536_v41 = vsel %vm507_vm5, %v2145_v27, %v495_v33 }
 0x195   :  { %v538_v37 = vsel %vm511_vm6, %v536_v41, %v498_v23  ;;  %v1812_v23 = vld [vmem:[%s2430_s7 + $0x20] sm:$0xff] }
 0x196   :  { %v540_v39 = vsel %vm514_vm7, %v538_v37, %v506_v26  ;;  %1195 = vmatpush.bf16.msrb.mxu2 %v1804_v7  ;;  %v1811_v26 = vld [vmem:[%s2430_s7 + $0x18] sm:$0xff] }
 0x197   :  { %1087 = vmatmul.bf16.vlgmr.msra.gmra.mxu1 %v540_v39  ;;  %1273 = vmatpush.bf16.msrb.mxu3 %v1813_v15 }
 0x19a   :  { %v554_v40 = vpop.permute.xlu1 %553 }
 0x19b   :  { %v545_v42 = vpop.permute.xlu0 %544  ;;  %v583_v19 = vpop.permute.xlu2 %582  ;;  %1274 = vmatpush.bf16.msrb.mxu3 %v1812_v23 }
 0x19c   :  { %v592_v45 = vsel %vm507_vm5, %v2133_v31, %v545_v42  ;;  %v594_v47 = vsel %vm507_vm5, %v2162_v5, %v545_v42 }
 0x19d   :  { %v596_v27 = vsel %vm511_vm6, %v592_v45, %v554_v40  ;;  %v598_v49 = vsel %vm511_vm6, %v594_v47, %v556_v46 }
 0x19f   :  { %1275 = vmatpush.bf16.msrb.mxu3 %v1811_v26 }
 0x1a2   :  { %v581_v43 = vpop.permute.xlu1 %580 }
 0x1a3   :  { %v562_v29 = vpop.permute.xlu0 %561 }
 0x1a4   :  { %v600_v48 = vsel %vm514_vm7, %v596_v27, %v562_v29 }
 0x1a5   :  { %v620_v31 = vrot.slane %v600_v48, 3 }
 0x1a7   :  { %1661 = vmatmul.msk.bf16.vlgmr.msrb.gmra.mxu1 %vm507_vm5, %v588_v24  ;;  %v605_v24 = vsel %vm507_vm5, %v566_v52, %v574_v14 }
 0x1a8   :  { %v609_v55 = vsel %vm511_vm6, %v605_v24, %v581_v43  ;;  %v1810_v43 = vld [vmem:[%s2430_s7 + $0x10] sm:$0xff] }
 0x1a9   :  { %1276 = vmatpush.bf16.msrb.mxu3 %v1810_v43 }
 0x1aa   :  { %v564_v44 = vpop.permute.xlu1 %563 }
 0x1ab   :  { %v602_v50 = vsel %vm514_vm7, %v598_v49, %v564_v44  ;;  %v576_v35 = vpop.permute.xlu0 %575 }
 0x1ac   :  { %v621_v51 = vrot.slane %v602_v50, 3  ;;  %v607_v18 = vsel %vm507_vm5, %v566_v52, %v576_v35  ;;  %v1819_v52 = vld [vmem:[%s2432_s9 + $0x18] sm:$0xff] }
 0x1ad   :  { %v611_v54 = vsel %vm511_vm6, %v607_v18, %v583_v19  ;;  %1329 = vmatpush.bf16.msra.mxu1 %v1819_v52  ;;  %v1817_v18 = vld [vmem:[%s2432_s9 + $0x8] sm:$0xff]  ;;  %v1850_v19 = vld [vmem:[%s2429_s6] ss:$0 sm:$0xff] }
 0x1ae   :  { %v622_v5 = vsel %vm443_vm0, %v620_v31, %v621_v51  ;;  %v1809_v31 = vld [vmem:[%s2430_s7 + $0x8] sm:$0xff]  ;;  %v1808_v51 = vld [vmem:[%s2430_s7] sm:$0xff] }
 0x1af   :  { %1101 = vmatmul.bf16.vlgmr.msra.gmra.mxu2 %v622_v5  ;;  %1277 = vmatpush.bf16.msrb.mxu3 %v1809_v31  ;;  %v1818_v5 = vld [vmem:[%s2432_s9 + $0x10] sm:$0xff] }
 0x1b1   :  { %1330 = vmatpush.bf16.msra.mxu1 %v1818_v5 }
 0x1b2   :  { %v587_v53 = vpop.permute.xlu1 %586 }
 0x1b3   :  { %v615_v56 = vsel %vm514_vm7, %v611_v54, %v587_v53  ;;  %v585_v57 = vpop.permute.xlu0 %584  ;;  %1278 = vmatpush.bf16.msrb.mxu3 %v1808_v51 }
 0x1b4   :  { %v624_v58 = vrot.slane %v615_v56, 3  ;;  %v613_v59 = vsel %vm514_vm7, %v609_v55, %v585_v57  ;;  %v1816_v57 = vld [vmem:[%s2432_s9] sm:$0xff] }
 0x1b5   :  { %v623_v60 = vrot.slane %v613_v59, 3  ;;  %1331 = vmatpush.bf16.msra.mxu1 %v1817_v18 }
 0x1b7   :  { %v625_v61 = vsel %vm443_vm0, %v623_v60, %v624_v58  ;;  %v1851_v58 = vld [vmem:[%s2431_s8] ss:$0 sm:$0xff] }
 0x1b8   :  { %1115 = vmatmul.bf16.vlgmr.msra.gmra.mxu3 %v625_v61 }
 0x1b9   :  { %1332 = vmatpush.bf16.msra.mxu1 %v1816_v57 }
 0x202   :  { %v1046_v62 = vpop.f32.mrf.mxu1 }
 0x203   :  { %v1047_v30 = vadd.f32 %v1849_v4, %v1046_v62 }
 0x209   :  { %v1060_v0 = vpop.f32.mrf.mxu2 }
 0x20a   :  { %v1048_v63 = vpop.f32.mrf.mxu1  ;;  %v1061_v6 = vadd.f32 %v1060_v0, %v1047_v30 }
 0x20b   :  { %v1049_v13 = vadd.f32 %v1849_v4, %v1048_v63 }
 0x211   :  { %v1074_v2 = vpop.f32.mrf.mxu3  ;;  %v1062_v38 = vpop.f32.mrf.mxu2 }
 0x212   :  { %v1075_v10 = vadd.f32 %v1074_v2, %v1061_v6  ;;  %v1063_v16 = vadd.f32 %v1062_v38, %v1049_v13 }
 0x214   :  { %v1088_v34 = vpop.f32.mrf.mxu1 }
 0x215   :  { %v1089_v14 = vadd.f32 %v1088_v34, %v1075_v10 }
 0x219   :  { %v1076_v22 = vpop.f32.mrf.mxu3 }
 0x21a   :  { %v1077_v21 = vadd.f32 %v1076_v22, %v1063_v16 }
 0x21c   :  { %v1090_v8 = vpop.f32.mrf.mxu1 }
 0x21d   :  { %v1091_v41 = vadd.f32 %v1090_v8, %v1077_v21 }
 0x224   :  { %v1130_v20 = vpop.f32.mrf.mxu1 }
 0x22c   :  { %v1132_v29 = vpop.f32.mrf.mxu1 }
 0x232   :  { %v1102_v12 = vpop.f32.mrf.mxu2 }
 0x233   :  { %v1103_v17 = vadd.f32 %v1102_v12, %v1089_v14 }
 0x23a   :  { %v1104_v25 = vpop.f32.mrf.mxu2 }
 0x23b   :  { %v1116_v28 = vpop.f32.mrf.mxu3  ;;  %v1105_v37 = vadd.f32 %v1104_v25, %v1091_v41 }
 0x23c   :  { %v1117_v36 = vadd.f32 %v1116_v28, %v1103_v17 }
 0x23e   :  { %v1131_v33 = vadd.f32 %v1130_v20, %v1117_v36 }
 0x240   :  { %v1135_v39 = vmax.f32 %v1131_v33, 0.0 }
 0x242   :  { %v1138_v45 = vrot.slane %v1135_v39, 2 }
 0x243   :  { %v1118_v40 = vpop.f32.mrf.mxu3 }
 0x244   :  { %v1119_v42 = vadd.f32 %v1118_v40, %v1105_v37  ;;  %v1140_v27 = vmax.f32 %v1135_v39, %v1138_v45 }
 0x246   :  { %v1133_v46 = vadd.f32 %v1132_v29, %v1119_v42 }
 0x248   :  { %v1136_v47 = vmax.f32 %v1133_v46, 0.0 }
 0x24a   :  { %v1142_v48 = vrot.slane %v1136_v47, 4  ;;  %v1145_v49 = vrot.slane %v1136_v47, 6 }
 0x24c   :  { %v1144_v44 = vmax.f32 %v1140_v27, %v1142_v48 }
 0x24e   :  { %v1147_v50 = vmax.f32 %v1144_v44, %v1145_v49 }
 0x250   :  { %v1148_v35 = vpack.c.bf16 %v1147_v50, %v1147_v50 }
 0x252   :  { %1678 = vmatmul.msk.bf16.vlgmr.msrb.gmra.mxu2 %vm511_vm6, %v1148_v35 }
 0x2d5   :  { %v1197_v24 = vpop.f32.mrf.mxu2 }
 0x2d6   :  { %v1198_v53 = vadd.f32 %v1850_v19, %v1197_v24 }
 0x2d8   :  { %v1201_v54 = vmax.f32 %v1198_v53, 0.0 }
 0x2da   :  { %v1202_v55 = vpack.c.bf16 %v1201_v54, %v1201_v54 }
 0x2dc   :  { %1279 = vmatmul.bf16.vlgmr.msrb.gmra.mxu3 %v1202_v55 }
 0x2dd   :  { %v1199_v56 = vpop.f32.mrf.mxu2 }
 0x35f   :  { %v1280_v59 = vpop.f32.mrf.mxu3 }
 0x360   :  { %v1281_v60 = vadd.f32 %v1851_v58, %v1280_v59 }
 0x362   :  { %v1284_v61 = vmax.f32 %v1281_v60, 0.0 }
 0x364   :  { %v1285_v62 = vpack.c.bf16 %v1284_v61, %v1284_v61 }
 0x366   :  { %1727 = vmatmul.msk.bf16.vlgmr.msra.gmra.mxu1 %vm511_vm6, %v1285_v62 }
 0x367   :  { %v1282_v63 = vpop.f32.mrf.mxu3 }
 0x3e3   :  { %v1334_v0 = vpop.f32.mrf.mxu1 }
 0x3e4   :  { %v1335_v1 = vadd.f32 %v1852_v32, %v1334_v0 }
 0x3e6   :  { %1339 = vst.msk [vmem:[#allocation2] sm:$0x3] %vm1338_vm8, %v1335_v1 }
 0x3e7   :  { %1350 = dma.vmem_to_hbm [thread:$0]  %s1346_s4, 32, %s1348_s16, [#allocation3]  }
 0x3eb   :  { %v1336_v34 = vpop.f32.mrf.mxu1 }
 0x3ec   :  { %1877 = dma.done.wait [#allocation3], 32  }
 0x3ed   :  { %1878 = vsyncadd [#allocation3], 4294967264 }
 0x3ee   :  { %1355 = vsyncpa [#allocation3], 1 }

</bundles_post_ra>
